<compile_context>
chip_gen: v5e
topology: v5e:2x2
jax: 0.10.0
libtpu: 0.0.40
codegen_flags: <defaults>
</compile_context>

<pallas_src>
import functools

import jax
import jax.numpy as jnp
from jax.experimental import pallas as pl
from jax.experimental.pallas import tpu as pltpu

LANE = 128


def _round_up(x, m):
    return ((x + m - 1) // m) * m


def hgnn_kernel(x_ref, h_ref, s_ref, invde_ref, w1_ref, b1_ref, gamma_ref,
                beta_ref, w2_ref, b2_ref, o_ref,
                t1_ref, t2_ref, bsum_ref, bssq_ref, bscale_ref, bshift_ref,
                *, n_nodes):
    f32 = jnp.float32
    bf16 = jnp.bfloat16

    p = pl.program_id(0)          # pass index (0..3)
    i = pl.program_id(1)          # node-tile index
    last_i = pl.num_programs(1) - 1

    # H factors for this node tile, bf16 only (no f32 copies kept live).
    hs_bf = h_ref[...] * s_ref[...].astype(bf16)        # diag(Dv^-1/2) H  (tn, Ep)
    invde_bf = invde_ref[...].astype(bf16)               # De^-1           (1, Ep)

    # Contract sublane dim 0 of both operands == A^T @ B fed straight to the MXU.
    tdims = (((0,), (0,)), ((), ()))

    @pl.when((p == 0) & (i == 0))
    def _init():
        t1_ref[...] = jnp.zeros_like(t1_ref)
        t2_ref[...] = jnp.zeros_like(t2_ref)
        bsum_ref[...] = jnp.zeros_like(bsum_ref)
        bssq_ref[...] = jnp.zeros_like(bssq_ref)

    # ---- pass 0: T1 += (Hs*De^-1)[tile]^T @ (X[tile] @ W1 + b1)
    @pl.when(p == 0)
    def _pass0():
        x1 = jnp.dot(x_ref[...], w1_ref[...],
                     preferred_element_type=f32) + b1_ref[...]            # (tn, Hp) f32
        t1_ref[...] += jax.lax.dot_general(hs_bf * invde_bf, x1.astype(bf16),
                                           tdims, preferred_element_type=f32)

    # ---- pass 1: BN batch stats of GX = Hs @ T1 (single sweep: sum & sum-sq)
    @pl.when(p == 1)
    def _pass1():
        gx = jnp.dot(hs_bf, t1_ref[...].astype(bf16),
                     preferred_element_type=f32)                          # (tn, Hp) f32
        bsum_ref[...] += jnp.sum(gx, axis=0, keepdims=True)
        bssq_ref[...] += jnp.sum(gx * gx, axis=0, keepdims=True)

    @pl.when((p == 1) & (i == last_i))
    def _bn_finalize():
        inv_n = 1.0 / float(n_nodes)                 # true N (padded rows are zero)
        mean = bsum_ref[...] * inv_n
        var = jnp.maximum(bssq_ref[...] * inv_n - mean * mean, 0.0)
        scale = gamma_ref[...] * jax.lax.rsqrt(var + 1e-5)
        bscale_ref[...] = scale
        bshift_ref[...] = beta_ref[...] - mean * scale

    # ---- pass 2: T2 += (Hs*De^-1)[tile]^T @ (lrelu(bn(GX[tile])) @ W2 + b2)
    @pl.when(p == 2)
    def _pass2():
        gx = jnp.dot(hs_bf, t1_ref[...].astype(bf16),
                     preferred_element_type=f32)
        xb = gx * bscale_ref[...] + bshift_ref[...]
        xl = jnp.where(xb >= 0, xb, 0.1 * xb)                             # LeakyReLU(0.1)
        x2 = jnp.dot(xl.astype(bf16), w2_ref[...],
                     preferred_element_type=f32) + b2_ref[...]            # (tn, Cp) f32
        t2_ref[...] += jax.lax.dot_general(hs_bf * invde_bf, x2.astype(bf16),
                                           tdims, preferred_element_type=f32)

    # ---- pass 3: out[tile] = Hs[tile] @ T2  (lane-dense f32 store)
    @pl.when(p == 3)
    def _pass3():
        o_ref[...] = jnp.dot(hs_bf, t2_ref[...].astype(bf16),
                             preferred_element_type=f32)


def hgnn_forward(X, H, W1, b1, gamma, beta, W2, b2, *, tile_n=256):
    f32, bf16 = jnp.float32, jnp.bfloat16
    N, D = X.shape
    E = H.shape[1]
    Hd = W1.shape[1]
    C = W2.shape[1]

    Ep = _round_up(E, LANE)
    Hp = _round_up(Hd, LANE)
    Cp = _round_up(C, LANE)
    tn = min(tile_n, _round_up(N, 8))
    Np = _round_up(N, tn)
    nt = Np // tn

    # Degree scalings hoisted to the wrapper, f32 on the raw incidence matrix:
    # no in-kernel XLU reductions, exact 1/De, and f32 accumulation even though
    # H is shipped to the kernel as bf16.  Zero-degree nodes/edges are guarded.
    Dv = jnp.sum(H, axis=1, keepdims=True)                 # (N, 1)
    De = jnp.sum(H, axis=0, keepdims=True)                 # (1, E)
    s = jnp.where(Dv > 0, jax.lax.rsqrt(Dv), 0.0).astype(f32)
    inv_de = jnp.where(De > 0, 1.0 / De, 0.0).astype(f32)

    def pad2(a, rows, cols):
        return jnp.pad(a, ((0, rows - a.shape[0]), (0, cols - a.shape[1])))

    Xp = pad2(X, Np, D).astype(bf16)          # feature dim left unpadded
    Hb = pad2(H, Np, Ep).astype(bf16)
    sp = pad2(s, Np, 1)
    idep = pad2(inv_de, 1, Ep)
    W1p = pad2(W1, D, Hp).astype(bf16)
    b1p = pad2(b1, 1, Hp)
    gp = pad2(gamma, 1, Hp)
    bp = pad2(beta, 1, Hp)
    W2p = pad2(W2, Hp, Cp).astype(bf16)
    b2p = pad2(b2, 1, Cp)

    # VMEM budget: double-buffered streaming tiles + resident weights/scratch.
    tile_bytes = tn * D * 2 + tn * Ep * 2 + tn * LANE * 4 + tn * Cp * 4
    resident_bytes = (8 * Ep * 4 + D * Hp * 2 + Hp * Cp * 2
                      + 7 * 8 * Hp * 4 + 2 * 8 * Cp * 4
                      + Ep * Hp * 4 + Ep * Cp * 4)
    vmem_limit = int(min(100 * 2**20, max(16 * 2**20, 2 * (2 * tile_bytes + resident_bytes))))

    flops = (2 * Np * D * Hp            # theta1
             + 3 * 2 * Np * Ep * Hp     # T1, GX (pass 1), GX (pass 2)
             + 2 * Np * Hp * Cp         # theta2
             + 2 * 2 * Np * Ep * Cp)    # T2, out
    bytes_accessed = (Np * D * 2 + 4 * Np * Ep * 2 + 4 * Np * 4 + Ep * 4
                      + D * Hp * 2 + Hp * Cp * 2 + 4 * Hp * 4 + Cp * 4
                      + 4 * Np * Cp * 4)
    cost = pl.CostEstimate(flops=flops, transcendentals=Hp,
                           bytes_accessed=bytes_accessed)

    out = pl.pallas_call(
        functools.partial(hgnn_kernel, n_nodes=N),
        out_shape=jax.ShapeDtypeStruct((Np, Cp), jnp.float32),
        grid_spec=pltpu.PrefetchScalarGridSpec(
            num_scalar_prefetch=0,
            grid=(4, nt),                                  # (pass, node tile)
            in_specs=[
                pl.BlockSpec((tn, D), lambda p, i: (i, 0)),     # X (bf16)
                pl.BlockSpec((tn, Ep), lambda p, i: (i, 0)),    # H (bf16)
                pl.BlockSpec((tn, 1), lambda p, i: (i, 0)),     # Dv^-1/2 (f32)
                pl.BlockSpec((1, Ep), lambda p, i: (0, 0)),     # De^-1 (f32)
                pl.BlockSpec((D, Hp), lambda p, i: (0, 0)),     # W1 (bf16)
                pl.BlockSpec((1, Hp), lambda p, i: (0, 0)),     # b1
                pl.BlockSpec((1, Hp), lambda p, i: (0, 0)),     # gamma
                pl.BlockSpec((1, Hp), lambda p, i: (0, 0)),     # beta
                pl.BlockSpec((Hp, Cp), lambda p, i: (0, 0)),    # W2 (bf16)
                pl.BlockSpec((1, Cp), lambda p, i: (0, 0)),     # b2
            ],
            out_specs=pl.BlockSpec((tn, Cp), lambda p, i: (i, 0)),
            scratch_shapes=[
                pltpu.VMEM((Ep, Hp), jnp.float32),   # T1
                pltpu.VMEM((Ep, Cp), jnp.float32),   # T2
                pltpu.VMEM((1, Hp), jnp.float32),    # BN sum
                pltpu.VMEM((1, Hp), jnp.float32),    # BN sum of squares
                pltpu.VMEM((1, Hp), jnp.float32),    # BN scale
                pltpu.VMEM((1, Hp), jnp.float32),    # BN shift
            ]),
        compiler_params=pltpu.CompilerParams(
            dimension_semantics=("arbitrary", "arbitrary"),
            vmem_limit_bytes=vmem_limit),
        cost_estimate=cost,
    )(Xp, Hb, sp, idep, W1p, b1p, gp, bp, W2p, b2p)

    return out[:N, :C]


def hgnn_reference(X, H, W1, b1, gamma, beta, W2, b2):
    """Pure-JAX f32 reference matching the PyTorch module (training-mode BN)."""
    Dv = jnp.sum(H, axis=1)
    De = jnp.sum(H, axis=0)
    G = (jnp.diag(Dv ** -0.5) @ H @ jnp.diag(De ** -1.0) @ H.T
         @ jnp.diag(Dv ** -0.5))
    X1 = G @ (X @ W1 + b1)
    mean = jnp.mean(X1, axis=0, keepdims=True)
    var = jnp.mean((X1 - mean) ** 2, axis=0, keepdims=True)
    Xn = (X1 - mean) / jnp.sqrt(var + 1e-5)
    Xb = Xn * gamma + beta
    Xl = jnp.where(Xb >= 0, Xb, 0.1 * Xb)
    return G @ (Xl @ W2 + b2)


if __name__ == "__main__":
    # Small, module-consistent shapes:
    #   N nodes = 16, n_edge = 8, sz_embed = 32, hidden = 32, nb_classes = 8
    N, E, D, Hd, C = 16, 8, 32, 32, 8

    key = jax.random.PRNGKey(0)
    kx, kh, kw1, kb1, kw2, kb2 = jax.random.split(key, 6)

    X = jax.random.normal(kx, (N, D), dtype=jnp.float32)
    # Positive incidence matrix so Dv > 0 and De > 0 (padded edges are guarded).
    H = jax.random.uniform(kh, (N, E), dtype=jnp.float32, minval=0.05, maxval=1.0)

    # PyTorch Linear-style init, weights stored transposed to (in, out).
    lim1 = 1.0 / jnp.sqrt(D)
    W1 = jax.random.uniform(kw1, (D, Hd), jnp.float32, -lim1, lim1)
    b1 = jax.random.uniform(kb1, (1, Hd), jnp.float32, -lim1, lim1)
    lim2 = 1.0 / jnp.sqrt(Hd)
    W2 = jax.random.uniform(kw2, (Hd, C), jnp.float32, -lim2, lim2)
    b2 = jax.random.uniform(kb2, (1, C), jnp.float32, -lim2, lim2)
    gamma = jnp.ones((1, Hd), jnp.float32)   # BatchNorm1d default weight
    beta = jnp.zeros((1, Hd), jnp.float32)   # BatchNorm1d default bias

    # tile_n=8 -> two node tiles, exercising the tiled accumulation / two-pass BN.
    out = hgnn_forward(X, H, W1, b1, gamma, beta, W2, b2, tile_n=8)
    out = jax.block_until_ready(out)

    assert out.shape == (N, C)
    assert bool(jnp.all(jnp.isfinite(out)))

    ref = hgnn_reference(X, H, W1, b1, gamma, beta, W2, b2)
    max_diff = float(jnp.max(jnp.abs(out - ref)))
    # bf16 MXU operands (incl. bf16-stored H) with f32 accumulation -> loose tolerance.
    assert max_diff < 1e-1, f"kernel vs reference max abs diff {max_diff}"

    print("KERNEL_OK")
</pallas_src>

<mosaic_0001>
module attributes {stable_mosaic.version = 11 : i64} {
  func.func @hgnn_kernel(%arg0: i32, %arg1: i32, %arg2: memref<8x32xbf16, #tpu.memory_space<vmem>>, %arg3: memref<8x128xbf16, #tpu.memory_space<vmem>>, %arg4: memref<8x1xf32, #tpu.memory_space<vmem>>, %arg5: memref<1x128xf32, #tpu.memory_space<vmem>>, %arg6: memref<32x128xbf16, #tpu.memory_space<vmem>>, %arg7: memref<1x128xf32, #tpu.memory_space<vmem>>, %arg8: memref<1x128xf32, #tpu.memory_space<vmem>>, %arg9: memref<1x128xf32, #tpu.memory_space<vmem>>, %arg10: memref<128x128xbf16, #tpu.memory_space<vmem>>, %arg11: memref<1x128xf32, #tpu.memory_space<vmem>>, %arg12: memref<8x128xf32, #tpu.memory_space<vmem>>, %arg13: memref<128x128xf32, #tpu.memory_space<vmem>>, %arg14: memref<128x128xf32, #tpu.memory_space<vmem>>, %arg15: memref<1x128xf32, #tpu.memory_space<vmem>>, %arg16: memref<1x128xf32, #tpu.memory_space<vmem>>, %arg17: memref<1x128xf32, #tpu.memory_space<vmem>>, %arg18: memref<1x128xf32, #tpu.memory_space<vmem>>) attributes {dimension_semantics = [#tpu.dimension_semantics<arbitrary>, #tpu.dimension_semantics<arbitrary>], iteration_bounds = array<i64: 4, 2>, scalar_prefetch = 0 : i64, scratch_operands = 6 : i64, tpu.core_type = #tpu.core_type<tc>, window_params = [{transform_indices = @transform_0, window_bounds = array<i64: 8, 32>}, {transform_indices = @transform_1, window_bounds = array<i64: 8, 128>}, {transform_indices = @transform_2, window_bounds = array<i64: 8, 1>}, {pipeline_mode = #tpu.pipeline_mode<synchronous>, transform_indices = @transform_3, window_bounds = array<i64: 1, 128>}, {pipeline_mode = #tpu.pipeline_mode<synchronous>, transform_indices = @transform_4, window_bounds = array<i64: 32, 128>}, {pipeline_mode = #tpu.pipeline_mode<synchronous>, transform_indices = @transform_5, window_bounds = array<i64: 1, 128>}, {pipeline_mode = #tpu.pipeline_mode<synchronous>, transform_indices = @transform_6, window_bounds = array<i64: 1, 128>}, {pipeline_mode = #tpu.pipeline_mode<synchronous>, transform_indices = @transform_7, window_bounds = array<i64: 1, 128>}, {pipeline_mode = #tpu.pipeline_mode<synchronous>, transform_indices = @transform_8, window_bounds = array<i64: 128, 128>}, {pipeline_mode = #tpu.pipeline_mode<synchronous>, transform_indices = @transform_9, window_bounds = array<i64: 1, 128>}, {transform_indices = @transform_10, window_bounds = array<i64: 8, 128>}]} {
    %c0 = arith.constant 0 : index
    %c0_0 = arith.constant 0 : index
    %0 = vector.load %arg3[%c0, %c0_0] : memref<8x128xbf16, #tpu.memory_space<vmem>>, vector<8x128xbf16>
    %c0_1 = arith.constant 0 : index
    %c0_2 = arith.constant 0 : index
    %1 = vector.load %arg4[%c0_1, %c0_2] : memref<8x1xf32, #tpu.memory_space<vmem>>, vector<8x1xf32>
    %2 = arith.truncf %1 : vector<8x1xf32> to vector<8x1xbf16>
    %3 = vector.broadcast %2 : vector<8x1xbf16> to vector<8x128xbf16>
    %4 = arith.mulf %0, %3 : vector<8x128xbf16>
    %c0_3 = arith.constant 0 : index
    %c0_4 = arith.constant 0 : index
    %5 = vector.load %arg5[%c0_3, %c0_4] : memref<1x128xf32, #tpu.memory_space<vmem>>, vector<1x128xf32>
    %6 = arith.truncf %5 : vector<1x128xf32> to vector<1x128xbf16>
    %c0_i32 = arith.constant 0 : i32
    %7 = arith.cmpi eq, %arg0, %c0_i32 : i32
    %c0_i32_5 = arith.constant 0 : i32
    %8 = arith.cmpi eq, %arg1, %c0_i32_5 : i32
    %9 = arith.andi %7, %8 : i1
    %10 = arith.extui %9 : i1 to i32
    %c0_i32_6 = arith.constant 0 : i32
    %11 = arith.cmpi ne, %10, %c0_i32_6 : i32
    scf.if %11 {
      %cst = arith.constant 0.000000e+00 : f32
      %29 = vector.broadcast %cst : f32 to vector<128x128xf32>
      %c0_15 = arith.constant 0 : index
      %c0_16 = arith.constant 0 : index
      %30 = vector.load %arg13[%c0_15, %c0_16] : memref<128x128xf32, #tpu.memory_space<vmem>>, vector<128x128xf32>
      tpu.vector_store %arg13[%c0_15, %c0_16], %29 {strides = array<i32>} : memref<128x128xf32, #tpu.memory_space<vmem>>, vector<128x128xf32>,
      %cst_17 = arith.constant 0.000000e+00 : f32
      %31 = vector.broadcast %cst_17 : f32 to vector<128x128xf32>
      %c0_18 = arith.constant 0 : index
      %c0_19 = arith.constant 0 : index
      %32 = vector.load %arg14[%c0_18, %c0_19] : memref<128x128xf32, #tpu.memory_space<vmem>>, vector<128x128xf32>
      tpu.vector_store %arg14[%c0_18, %c0_19], %31 {strides = array<i32>} : memref<128x128xf32, #tpu.memory_space<vmem>>, vector<128x128xf32>,
      %cst_20 = arith.constant 0.000000e+00 : f32
      %33 = vector.broadcast %cst_20 : f32 to vector<1x128xf32>
      %c0_21 = arith.constant 0 : index
      %c0_22 = arith.constant 0 : index
      %34 = vector.load %arg15[%c0_21, %c0_22] : memref<1x128xf32, #tpu.memory_space<vmem>>, vector<1x128xf32>
      tpu.vector_store %arg15[%c0_21, %c0_22], %33 {strides = array<i32>} : memref<1x128xf32, #tpu.memory_space<vmem>>, vector<1x128xf32>,
      %cst_23 = arith.constant 0.000000e+00 : f32
      %35 = vector.broadcast %cst_23 : f32 to vector<1x128xf32>
      %c0_24 = arith.constant 0 : index
      %c0_25 = arith.constant 0 : index
      %36 = vector.load %arg16[%c0_24, %c0_25] : memref<1x128xf32, #tpu.memory_space<vmem>>, vector<1x128xf32>
      tpu.vector_store %arg16[%c0_24, %c0_25], %35 {strides = array<i32>} : memref<1x128xf32, #tpu.memory_space<vmem>>, vector<1x128xf32>,
    } else {
    }
    %c0_i32_7 = arith.constant 0 : i32
    %12 = arith.cmpi eq, %arg0, %c0_i32_7 : i32
    %13 = arith.extui %12 : i1 to i32
    %c0_i32_8 = arith.constant 0 : i32
    %14 = arith.cmpi ne, %13, %c0_i32_8 : i32
    scf.if %14 {
      %c0_15 = arith.constant 0 : index
      %c0_16 = arith.constant 0 : index
      %29 = vector.load %arg2[%c0_15, %c0_16] : memref<8x32xbf16, #tpu.memory_space<vmem>>, vector<8x32xbf16>
      %c0_17 = arith.constant 0 : index
      %c0_18 = arith.constant 0 : index
      %30 = vector.load %arg6[%c0_17, %c0_18] : memref<32x128xbf16, #tpu.memory_space<vmem>>, vector<32x128xbf16>
      %cst = arith.constant dense<0.000000e+00> : vector<8x128xf32>
      %31 = tpu.matmul %29, %30, %cst {dimension_numbers = #tpu.dot_dimension_numbers<[1], [0], [0], [1], [0, 0, 1, 1], [], []>} : vector<8x32xbf16>, vector<32x128xbf16>, vector<8x128xf32> -> vector<8x128xf32>
      %c0_19 = arith.constant 0 : index
      %c0_20 = arith.constant 0 : index
      %32 = vector.load %arg7[%c0_19, %c0_20] : memref<1x128xf32, #tpu.memory_space<vmem>>, vector<1x128xf32>
      %33 = vector.broadcast %32 : vector<1x128xf32> to vector<8x128xf32>
      %34 = arith.addf %31, %33 : vector<8x128xf32>
      %c0_21 = arith.constant 0 : index
      %c0_22 = arith.constant 0 : index
      %35 = vector.load %arg13[%c0_21, %c0_22] : memref<128x128xf32, #tpu.memory_space<vmem>>, vector<128x128xf32>
      %36 = vector.broadcast %6 : vector<1x128xbf16> to vector<8x128xbf16>
      %37 = arith.mulf %4, %36 : vector<8x128xbf16>
      %38 = arith.truncf %34 : vector<8x128xf32> to vector<8x128xbf16>
      %cst_23 = arith.constant dense<0.000000e+00> : vector<128x128xf32>
      %39 = tpu.matmul %37, %38, %cst_23 {dimension_numbers = #tpu.dot_dimension_numbers<[0], [0], [1], [1], [0, 1, 1, 1], [], []>} : vector<8x128xbf16>, vector<8x128xbf16>, vector<128x128xf32> -> vector<128x128xf32>
      %40 = arith.addf %35, %39 : vector<128x128xf32>
      %c0_24 = arith.constant 0 : index
      %c0_25 = arith.constant 0 : index
      %41 = vector.load %arg13[%c0_24, %c0_25] : memref<128x128xf32, #tpu.memory_space<vmem>>, vector<128x128xf32>
      tpu.vector_store %arg13[%c0_24, %c0_25], %40 {strides = array<i32>} : memref<128x128xf32, #tpu.memory_space<vmem>>, vector<128x128xf32>,
    } else {
    }
    %c1_i32 = arith.constant 1 : i32
    %15 = arith.cmpi eq, %arg0, %c1_i32 : i32
    %16 = arith.extui %15 : i1 to i32
    %c0_i32_9 = arith.constant 0 : i32
    %17 = arith.cmpi ne, %16, %c0_i32_9 : i32
    scf.if %17 {
      %c0_15 = arith.constant 0 : index
      %c0_16 = arith.constant 0 : index
      %29 = vector.load %arg13[%c0_15, %c0_16] : memref<128x128xf32, #tpu.memory_space<vmem>>, vector<128x128xf32>
      %30 = arith.truncf %29 : vector<128x128xf32> to vector<128x128xbf16>
      %cst = arith.constant dense<0.000000e+00> : vector<8x128xf32>
      %31 = tpu.matmul %4, %30, %cst {dimension_numbers = #tpu.dot_dimension_numbers<[1], [0], [0], [1], [0, 0, 1, 1], [], []>} : vector<8x128xbf16>, vector<128x128xbf16>, vector<8x128xf32> -> vector<8x128xf32>
      %c0_17 = arith.constant 0 : index
      %c0_18 = arith.constant 0 : index
      %32 = vector.load %arg15[%c0_17, %c0_18] : memref<1x128xf32, #tpu.memory_space<vmem>>, vector<1x128xf32>
      %cst_19 = arith.constant dense<0.000000e+00> : vector<128xf32>
      %33 = vector.multi_reduction <add>, %31, %cst_19 [0] : vector<8x128xf32> to vector<128xf32>
      %34 = vector.shape_cast %33 : vector<128xf32> to vector<1x128xf32>
      %35 = arith.addf %32, %34 : vector<1x128xf32>
      %c0_20 = arith.constant 0 : index
      %c0_21 = arith.constant 0 : index
      %36 = vector.load %arg15[%c0_20, %c0_21] : memref<1x128xf32, #tpu.memory_space<vmem>>, vector<1x128xf32>
      tpu.vector_store %arg15[%c0_20, %c0_21], %35 {strides = array<i32>} : memref<1x128xf32, #tpu.memory_space<vmem>>, vector<1x128xf32>,
      %c0_22 = arith.constant 0 : index
      %c0_23 = arith.constant 0 : index
      %37 = vector.load %arg16[%c0_22, %c0_23] : memref<1x128xf32, #tpu.memory_space<vmem>>, vector<1x128xf32>
      %38 = arith.mulf %31, %31 : vector<8x128xf32>
      %cst_24 = arith.constant dense<0.000000e+00> : vector<128xf32>
      %39 = vector.multi_reduction <add>, %38, %cst_24 [0] : vector<8x128xf32> to vector<128xf32>
      %40 = vector.shape_cast %39 : vector<128xf32> to vector<1x128xf32>
      %41 = arith.addf %37, %40 : vector<1x128xf32>
      %c0_25 = arith.constant 0 : index
      %c0_26 = arith.constant 0 : index
      %42 = vector.load %arg16[%c0_25, %c0_26] : memref<1x128xf32, #tpu.memory_space<vmem>>, vector<1x128xf32>
      tpu.vector_store %arg16[%c0_25, %c0_26], %41 {strides = array<i32>} : memref<1x128xf32, #tpu.memory_space<vmem>>, vector<1x128xf32>,
    } else {
    }
    %c1_i32_10 = arith.constant 1 : i32
    %18 = arith.cmpi eq, %arg0, %c1_i32_10 : i32
    %c1_i32_11 = arith.constant 1 : i32
    %19 = arith.cmpi eq, %arg1, %c1_i32_11 : i32
    %20 = arith.andi %18, %19 : i1
    %21 = arith.extui %20 : i1 to i32
    %c0_i32_12 = arith.constant 0 : i32
    %22 = arith.cmpi ne, %21, %c0_i32_12 : i32
    scf.if %22 {
      %c0_15 = arith.constant 0 : index
      %c0_16 = arith.constant 0 : index
      %29 = vector.load %arg15[%c0_15, %c0_16] : memref<1x128xf32, #tpu.memory_space<vmem>>, vector<1x128xf32>
      %cst = arith.constant 6.250000e-02 : f32
      %30 = vector.broadcast %cst : f32 to vector<1x128xf32>
      %31 = arith.mulf %29, %30 : vector<1x128xf32>
      %c0_17 = arith.constant 0 : index
      %c0_18 = arith.constant 0 : index
      %32 = vector.load %arg16[%c0_17, %c0_18] : memref<1x128xf32, #tpu.memory_space<vmem>>, vector<1x128xf32>
      %cst_19 = arith.constant 6.250000e-02 : f32
      %33 = vector.broadcast %cst_19 : f32 to vector<1x128xf32>
      %34 = arith.mulf %32, %33 : vector<1x128xf32>
      %35 = arith.mulf %31, %31 : vector<1x128xf32>
      %36 = arith.subf %34, %35 : vector<1x128xf32>
      %cst_20 = arith.constant 0.000000e+00 : f32
      %37 = vector.broadcast %cst_20 : f32 to vector<1x128xf32>
      %38 = arith.maximumf %36, %37 : vector<1x128xf32>
      %c0_21 = arith.constant 0 : index
      %c0_22 = arith.constant 0 : index
      %39 = vector.load %arg8[%c0_21, %c0_22] : memref<1x128xf32, #tpu.memory_space<vmem>>, vector<1x128xf32>
      %cst_23 = arith.constant 9.99999974E-6 : f32
      %40 = vector.broadcast %cst_23 : f32 to vector<1x128xf32>
      %41 = arith.addf %38, %40 : vector<1x128xf32>
      %42 = math.rsqrt %41 : vector<1x128xf32>
      %43 = arith.mulf %39, %42 : vector<1x128xf32>
      %c0_24 = arith.constant 0 : index
      %c0_25 = arith.constant 0 : index
      %44 = vector.load %arg17[%c0_24, %c0_25] : memref<1x128xf32, #tpu.memory_space<vmem>>, vector<1x128xf32>
      tpu.vector_store %arg17[%c0_24, %c0_25], %43 {strides = array<i32>} : memref<1x128xf32, #tpu.memory_space<vmem>>, vector<1x128xf32>,
      %c0_26 = arith.constant 0 : index
      %c0_27 = arith.constant 0 : index
      %45 = vector.load %arg9[%c0_26, %c0_27] : memref<1x128xf32, #tpu.memory_space<vmem>>, vector<1x128xf32>
      %46 = arith.mulf %31, %43 : vector<1x128xf32>
      %47 = arith.subf %45, %46 : vector<1x128xf32>
      %c0_28 = arith.constant 0 : index
      %c0_29 = arith.constant 0 : index
      %48 = vector.load %arg18[%c0_28, %c0_29] : memref<1x128xf32, #tpu.memory_space<vmem>>, vector<1x128xf32>
      tpu.vector_store %arg18[%c0_28, %c0_29], %47 {strides = array<i32>} : memref<1x128xf32, #tpu.memory_space<vmem>>, vector<1x128xf32>,
    } else {
    }
    %c2_i32 = arith.constant 2 : i32
    %23 = arith.cmpi eq, %arg0, %c2_i32 : i32
    %24 = arith.extui %23 : i1 to i32
    %c0_i32_13 = arith.constant 0 : i32
    %25 = arith.cmpi ne, %24, %c0_i32_13 : i32
    scf.if %25 {
      %c0_15 = arith.constant 0 : index
      %c0_16 = arith.constant 0 : index
      %29 = vector.load %arg13[%c0_15, %c0_16] : memref<128x128xf32, #tpu.memory_space<vmem>>, vector<128x128xf32>
      %30 = arith.truncf %29 : vector<128x128xf32> to vector<128x128xbf16>
      %cst = arith.constant dense<0.000000e+00> : vector<8x128xf32>
      %31 = tpu.matmul %4, %30, %cst {dimension_numbers = #tpu.dot_dimension_numbers<[1], [0], [0], [1], [0, 0, 1, 1], [], []>} : vector<8x128xbf16>, vector<128x128xbf16>, vector<8x128xf32> -> vector<8x128xf32>
      %c0_17 = arith.constant 0 : index
      %c0_18 = arith.constant 0 : index
      %32 = vector.load %arg17[%c0_17, %c0_18] : memref<1x128xf32, #tpu.memory_space<vmem>>, vector<1x128xf32>
      %33 = vector.broadcast %32 : vector<1x128xf32> to vector<8x128xf32>
      %34 = arith.mulf %31, %33 : vector<8x128xf32>
      %c0_19 = arith.constant 0 : index
      %c0_20 = arith.constant 0 : index
      %35 = vector.load %arg18[%c0_19, %c0_20] : memref<1x128xf32, #tpu.memory_space<vmem>>, vector<1x128xf32>
      %36 = vector.broadcast %35 : vector<1x128xf32> to vector<8x128xf32>
      %37 = arith.addf %34, %36 : vector<8x128xf32>
      %cst_21 = arith.constant 0.000000e+00 : f32
      %38 = vector.broadcast %cst_21 : f32 to vector<8x128xf32>
      %39 = arith.cmpf oge, %37, %38 : vector<8x128xf32>
      %cst_22 = arith.constant 1.000000e-01 : f32
      %40 = vector.broadcast %cst_22 : f32 to vector<8x128xf32>
      %41 = arith.mulf %40, %37 : vector<8x128xf32>
      %42 = arith.select %39, %37, %41 : vector<8x128xi1>, vector<8x128xf32>
      %43 = arith.truncf %42 : vector<8x128xf32> to vector<8x128xbf16>
      %c0_23 = arith.constant 0 : index
      %c0_24 = arith.constant 0 : index
      %44 = vector.load %arg10[%c0_23, %c0_24] : memref<128x128xbf16, #tpu.memory_space<vmem>>, vector<128x128xbf16>
      %cst_25 = arith.constant dense<0.000000e+00> : vector<8x128xf32>
      %45 = tpu.matmul %43, %44, %cst_25 {dimension_numbers = #tpu.dot_dimension_numbers<[1], [0], [0], [1], [0, 0, 1, 1], [], []>} : vector<8x128xbf16>, vector<128x128xbf16>, vector<8x128xf32> -> vector<8x128xf32>
      %c0_26 = arith.constant 0 : index
      %c0_27 = arith.constant 0 : index
      %46 = vector.load %arg11[%c0_26, %c0_27] : memref<1x128xf32, #tpu.memory_space<vmem>>, vector<1x128xf32>
      %47 = vector.broadcast %46 : vector<1x128xf32> to vector<8x128xf32>
      %48 = arith.addf %45, %47 : vector<8x128xf32>
      %c0_28 = arith.constant 0 : index
      %c0_29 = arith.constant 0 : index
      %49 = vector.load %arg14[%c0_28, %c0_29] : memref<128x128xf32, #tpu.memory_space<vmem>>, vector<128x128xf32>
      %50 = vector.broadcast %6 : vector<1x128xbf16> to vector<8x128xbf16>
      %51 = arith.mulf %4, %50 : vector<8x128xbf16>
      %52 = arith.truncf %48 : vector<8x128xf32> to vector<8x128xbf16>
      %cst_30 = arith.constant dense<0.000000e+00> : vector<128x128xf32>
      %53 = tpu.matmul %51, %52, %cst_30 {dimension_numbers = #tpu.dot_dimension_numbers<[0], [0], [1], [1], [0, 1, 1, 1], [], []>} : vector<8x128xbf16>, vector<8x128xbf16>, vector<128x128xf32> -> vector<128x128xf32>
      %54 = arith.addf %49, %53 : vector<128x128xf32>
      %c0_31 = arith.constant 0 : index
      %c0_32 = arith.constant 0 : index
      %55 = vector.load %arg14[%c0_31, %c0_32] : memref<128x128xf32, #tpu.memory_space<vmem>>, vector<128x128xf32>
      tpu.vector_store %arg14[%c0_31, %c0_32], %54 {strides = array<i32>} : memref<128x128xf32, #tpu.memory_space<vmem>>, vector<128x128xf32>,
    } else {
    }
    %c3_i32 = arith.constant 3 : i32
    %26 = arith.cmpi eq, %arg0, %c3_i32 : i32
    %27 = arith.extui %26 : i1 to i32
    %c0_i32_14 = arith.constant 0 : i32
    %28 = arith.cmpi ne, %27, %c0_i32_14 : i32
    scf.if %28 {
      %c0_15 = arith.constant 0 : index
      %c0_16 = arith.constant 0 : index
      %29 = vector.load %arg14[%c0_15, %c0_16] : memref<128x128xf32, #tpu.memory_space<vmem>>, vector<128x128xf32>
      %30 = arith.truncf %29 : vector<128x128xf32> to vector<128x128xbf16>
      %cst = arith.constant dense<0.000000e+00> : vector<8x128xf32>
      %31 = tpu.matmul %4, %30, %cst {dimension_numbers = #tpu.dot_dimension_numbers<[1], [0], [0], [1], [0, 0, 1, 1], [], []>} : vector<8x128xbf16>, vector<128x128xbf16>, vector<8x128xf32> -> vector<8x128xf32>
      %c0_17 = arith.constant 0 : index
      %c0_18 = arith.constant 0 : index
      %32 = vector.load %arg12[%c0_17, %c0_18] : memref<8x128xf32, #tpu.memory_space<vmem>>, vector<8x128xf32>
      tpu.vector_store %arg12[%c0_17, %c0_18], %31 {strides = array<i32>} : memref<8x128xf32, #tpu.memory_space<vmem>>, vector<8x128xf32>,
    } else {
    }
    return
  }
  func.func @transform_0(%arg0: i32, %arg1: i32) -> (i32, i32) {
    %c0_i32 = arith.constant 0 : i32
    %c0_i32_0 = arith.constant 0 : i32
    return %arg1, %c0_i32 : i32, i32
  }
  func.func @transform_1(%arg0: i32, %arg1: i32) -> (i32, i32) {
    %c0_i32 = arith.constant 0 : i32
    %c0_i32_0 = arith.constant 0 : i32
    return %arg1, %c0_i32 : i32, i32
  }
  func.func @transform_2(%arg0: i32, %arg1: i32) -> (i32, i32) {
    %c0_i32 = arith.constant 0 : i32
    %c0_i32_0 = arith.constant 0 : i32
    return %arg1, %c0_i32 : i32, i32
  }
  func.func @transform_3(%arg0: i32, %arg1: i32) -> (i32, i32) {
    %c0_i32 = arith.constant 0 : i32
    %c0_i32_0 = arith.constant 0 : i32
    %c0_i32_1 = arith.constant 0 : i32
    return %c0_i32, %c0_i32_0 : i32, i32
  }
  func.func @transform_4(%arg0: i32, %arg1: i32) -> (i32, i32) {
    %c0_i32 = arith.constant 0 : i32
    %c0_i32_0 = arith.constant 0 : i32
    %c0_i32_1 = arith.constant 0 : i32
    return %c0_i32, %c0_i32_0 : i32, i32
  }
  func.func @transform_5(%arg0: i32, %arg1: i32) -> (i32, i32) {
    %c0_i32 = arith.constant 0 : i32
    %c0_i32_0 = arith.constant 0 : i32
    %c0_i32_1 = arith.constant 0 : i32
    return %c0_i32, %c0_i32_0 : i32, i32
  }
  func.func @transform_6(%arg0: i32, %arg1: i32) -> (i32, i32) {
    %c0_i32 = arith.constant 0 : i32
    %c0_i32_0 = arith.constant 0 : i32
    %c0_i32_1 = arith.constant 0 : i32
    return %c0_i32, %c0_i32_0 : i32, i32
  }
  func.func @transform_7(%arg0: i32, %arg1: i32) -> (i32, i32) {
    %c0_i32 = arith.constant 0 : i32
    %c0_i32_0 = arith.constant 0 : i32
    %c0_i32_1 = arith.constant 0 : i32
    return %c0_i32, %c0_i32_0 : i32, i32
  }
  func.func @transform_8(%arg0: i32, %arg1: i32) -> (i32, i32) {
    %c0_i32 = arith.constant 0 : i32
    %c0_i32_0 = arith.constant 0 : i32
    %c0_i32_1 = arith.constant 0 : i32
    return %c0_i32, %c0_i32_0 : i32, i32
  }
  func.func @transform_9(%arg0: i32, %arg1: i32) -> (i32, i32) {
    %c0_i32 = arith.constant 0 : i32
    %c0_i32_0 = arith.constant 0 : i32
    %c0_i32_1 = arith.constant 0 : i32
    return %c0_i32, %c0_i32_0 : i32, i32
  }
  func.func @transform_10(%arg0: i32, %arg1: i32) -> (i32, i32) {
    %c0_i32 = arith.constant 0 : i32
    %c0_i32_0 = arith.constant 0 : i32
    return %arg1, %c0_i32 : i32, i32
  }
}

</mosaic_0001>

<bundles_post_ra>
// kernel: tpu_custom_call.1
= control target key start
LH: loop header
LB: loop body
LE: loop exit
PB: predicated region body
PF: predicated region fallthrough
CT: control target
= control target key end

     0   :  { %s1979_s0 = inlined_call_operand.hbm [shape: bf16[16,32], index: 0, kind: input, shape index: {}]   ;;  %s1980_s1 = inlined_call_operand.hbm [shape: bf16[16,128], index: 1, kind: input, shape index: {}]   ;;  %s1981_s2 = inlined_call_operand.vmem [shape: f32[16,1], index: 2, kind: input, shape index: {}]   ;;  %s1982_s3 = inlined_call_operand.vmem [shape: f32[1,128], index: 3, kind: input, shape index: {}]   ;;  %s1983_s4 = inlined_call_operand.vmem [shape: bf16[32,128], index: 4, kind: input, shape index: {}]   ;;  %s1984_s5 = inlined_call_operand.vmem [shape: f32[1,128], index: 5, kind: input, shape index: {}]   ;;  %s1985_s6 = inlined_call_operand.vmem [shape: f32[1,128], index: 6, kind: input, shape index: {}]   ;;  %s1986_s7 = inlined_call_operand.vmem [shape: f32[1,128], index: 7, kind: input, shape index: {}]   ;;  %s1987_s8 = inlined_call_operand.hbm [shape: bf16[128,128], index: 8, kind: input, shape index: {}]   ;;  %s1988_s9 = inlined_call_operand.vmem [shape: f32[1,128], index: 9, kind: input, shape index: {}]   ;;  %s1989_s10 = inlined_call_operand.hbm [shape: f32[16,128], index: 10, kind: output, shape index: {}]  }
   0x1   :  { %1999 = sst [smem:[#allocation28_spill]] %s1985_s6 }
   0x2   :  { %2000 = sst [smem:[#allocation29_spill]] %s1986_s7 }
   0x3   :  { %2001 = sst [smem:[#allocation30_spill]] %s1987_s8 }
   0x4   :  { %2002 = sst [smem:[#allocation31_spill]] %s1988_s9 }
   0x5   :  { %2003 = sst [smem:[#allocation32_spill]] %s1989_s10 }
   0x6   :  { %15 = vsyncpa [#allocation9], 0 }
   0x7   :  { %17 = vsyncpa [#allocation9 + $0x1], 0 }
   0x8   :  { %18 = vsyncpa [#allocation12], 0 }
   0x9   :  { %20 = vsyncpa [#allocation12 + $0x1], 0 }
   0xa   :  { %21 = vsyncpa [#allocation10], 0 }
   0xb   :  { %23 = vsyncpa [#allocation10 + $0x1], 0  ;;  %s1732_s13 = smov 0   ;;  %s1734_s14 = smov 0  }
   0xc   :  { %s1736_s15 = smov 0   ;;  %s1738_s16 = smov 0  }
   0xd   :  { %s1740_s17 = smov 0   ;;  %s1742_s18 = smov 0  }
   0xe   :  { %s1744_s19 = smov 0   ;;  %s1746_s20 = smov 0  }
   0xf LB: > { %2004 = sst [smem:[#allocation19_spill]] %s1641_s13  ;;  %s1773_s21 = sadd.s32 4294967295, %s1669_s20   ;;  %s1669_s20 = sphi %s1746_s20, %s29_s20   ;;  %s1665_s19 = sphi %s1744_s19, %s2032_s19   ;;  %s1661_s18 = sphi %s1742_s18, %s2036_s18   ;;  %s1657_s17 = sphi %s1740_s17, %s2030_s17   ;;  %s1653_s16 = sphi %s1738_s16, %s2029_s16   ;;  %s1649_s15 = sphi %s1736_s15, %s2035_s15   ;;  %s1645_s14 = sphi %s1734_s14, %s2034_s14   ;;  %s1641_s13 = sphi %s1732_s13, %s2033_s13  }
  0x10   : > { %2005 = sst [smem:[#allocation20_spill]] %s1649_s15  ;;  %p1274_p0 = scmp.ge.s32.totalorder %s1669_s20, 1 }
  0x11   : > { %2006 = sst [smem:[#allocation21_spill]] %s1661_s18  ;;  %p62_p1 = scmp.eq.s32.totalorder %s1773_s21, 0 }
  0x12   : > { %2007 = sst [smem:[#allocation22_spill]] %s1665_s19  ;;  %p297_p2 = scmp.lt.s32.totalorder %s1669_s20, 9 }
  0x13   : > { %s2008_s8 = sld [smem:[#allocation30_spill]]  ;;  %s1671_s26 = smov [#allocation13]  }
  0x14   : > { %p1781_p3 = pnand %p1274_p0, %p297_p2  ;;  %s325_s27 = sshll.u32 %s1671_s26, 4  ;;  %s326_s27 = int_to_ptr.vmem [resolvable:$true] %s325_s27 }
  0x15   : > { %s1672_s28 = smov 64   ;;  %s1673_s29 = smov 4  }
  0x16   : > { %p1375_p4 = pneg %p1781_p3  ;;  %s1273_s30 = sadd.s32 4294967294, %s1669_s20  }
  0x17   : > { %s38_s11 = sadd.s32 1, %s1661_s18  ;;  %s41_s12 = sadd.s32 1, %s1665_s19 }
  0x18   : > { %p1376_p5 = pnand %p1375_p4, %p62_p1  ;;  %p39_p6 = scmp.ge.s32.totalorder %s38_s11, 2 }
  0x19   : > { %s323_s24 = sshll.u32 %s2008_s8, 4  ;;  %s48_s22 = sadd.s32 1, %s1649_s15  ;;  %s324_s24 = int_to_ptr.hbm [resolvable:$true] %s323_s24 }
  0x1a   : > { %1378 = dma.hbm_to_vmem [thread:$0]  (!%p1376_p5), %s324_s24, 1024, %s326_s27, [#allocation12], %s1672_s28, %s1672_s28, %s1673_s29  }
  0x1b   : > { %p55_p7 = scmp.ne.s32.totalorder %s1649_s15, %s1645_s14  ;;  %p56_p8 = scmp.eq.s32.totalorder %s1669_s20, 0 }
  0x1c   : > { %s2038_s11 = smov (%p39_p6, %s38_s11), 0  ;;  %s2040_s12 = smov (!%p39_p6, %s41_s12), %s1665_s19 }
  0x1d   : > { %2010 = sst [smem:[#allocation23_spill]] %s2038_s11  ;;  %s45_s23 = ssub.s32 %s1661_s18, %s2038_s11 }
  0x1e   : > { %p1804_p9 = por %p56_p8, %p55_p7  ;;  %p43_p10 = scmp.ge.s32.totalorder %s2040_s12, 4 }
  0x1f   : > { %p46_p11 = scmp.eq.s32.totalorder %s45_s23, 0  ;;  %p61_p12 = scmp.ne.s32.totalorder %s1645_s14, %s1641_s13 }
  0x20   : > { %p284_p13 = scmp.eq.s32.totalorder %s1773_s21, 7  ;;  %s2042_s12 = smov (%p43_p10, %s2040_s12), 0 }
  0x21   : > { %2012 = sst [smem:[#allocation24_spill]] %s2042_s12  ;;  %p1818_p0 = por %p62_p1, %p61_p12 }
  0x22   : > { %s1814_s26 = scalar_select %p46_p11, %s1649_s15, %s48_s22  }
  0x23   : > { %p1825_p2 = por %p284_p13, %p55_p7  ;;  %p290_p4 = scmp.eq.s32.totalorder %s1273_s30, 7 }
  0x24   : > { %2013 = sst [smem:[#allocation25_spill]] %s1814_s26  ;;  %p1391_p5 = scmp.lt.s32.totalorder %s1669_s20, 8 }
  0x25   : > { %s2015_s28 = scalar_select %p1825_p2, 1, 0 }
  0x26   : > { %s342_s29 = sand.u32 1, %s1649_s15   ;;  %s1278_s23 = sshll.u32 %s1661_s18, 2 }
  0x27   : > { %2016 = sst [smem:[#allocation26_spill]] %s2015_s28  ;;  %p1832_p6 = por %p290_p4, %p61_p12 }
  0x28   : > { %s1277_s22 = sshll.u32 %s342_s29, 2  ;;  %s350_s19 = scalar_lea.hbm %s1979_s0, %s1278_s23 }
  0x29   : > { %s2017_s8 = scalar_select %p1832_p6, 1, 0 }
  0x2a   : > { %s352_s26 = sshll.u32 %s350_s19, 4  ;;  %s346_s13 = scalar_lea.vmem [#allocation8], %s1277_s22  ;;  %s353_s26 = int_to_ptr.hbm [resolvable:$true] %s352_s26 }
  0x2b   : > { %2018 = sst [smem:[#allocation27_spill]] %s2017_s8  ;;  %s354_s10 = sshll.u32 %s346_s13, 4  ;;  %s355_s10 = int_to_ptr.vmem [resolvable:$true] %s354_s10 }
  0x2c   : > { %p1380_p7 = pnand %p1391_p5, %p1804_p9  ;;  %s369_s18 = scalar_lea.hbm %s1980_s1, %s1278_s23 }
  0x2d   : > { %s361_s15 = sand.u32 1, %s1669_s20   ;;  %s343_s9 = scalar_lea.sflag [#allocation9], %s342_s29 }
  0x2e   : > { %1382 = dma.hbm_to_vmem [thread:$0]  (!%p1380_p7), %s353_s26, 64, %s355_s10, %s343_s9  }
  0x2f   : > { %s371_s8 = sshll.u32 %s369_s18, 4  ;;  %s365_s7 = scalar_lea.vmem [#allocation11], %s1277_s22  ;;  %s372_s8 = int_to_ptr.hbm [resolvable:$true] %s371_s8 }
  0x30   : > { %s373_s6 = sshll.u32 %s365_s7, 4  ;;  %s362_s11 = scalar_lea.sflag [#allocation12], %s361_s15  ;;  %s374_s6 = int_to_ptr.vmem [resolvable:$true] %s373_s6 }
  0x31   : > { %1385 = dma.hbm_to_vmem [thread:$0]  (!%p1380_p7), %s372_s8, 64, %s374_s6, %s362_s11  }
  0x32   : > { %389 = sbr.rel (%p1781_p3) target bundleno = 1598 (0x63e), region = 60  ;;  %s1848_s13 = sand.u32 (!%p1781_p3), 1, %s1645_s14  }
  0x33   : > { %s1282_s19 = sshll.u32 (!%p1781_p3), %s1848_s13, 2  ;;  %s392_s12 = scalar_lea.sflag (!%p1781_p3), [#allocation9], %s1848_s13 }
  0x34   : > { %s1852_s24 = scalar_lea.vmem (!%p1781_p3), [#allocation8], %s1282_s19 }
  0x37   : > { %1624 = dma.done.wait (%p1818_p0), %s392_s12, 64  }
  0x38   : > { %1626 = vsyncadd (%p1818_p0), %s392_s12, 4294967232  ;;  %s401_s6 = sand.u32 1, %s1773_s21   ;;  %s405_s8 = scalar_lea.vmem [#allocation11], %s1282_s19 }
  0x39   : > { %s402_s7 = scalar_lea.sflag [#allocation12], %s401_s6 }
  0x3a   : > { %1628 = dma.done.wait (%p1818_p0), %s402_s7, 64  }
  0x3b   : > { %1630 = vsyncadd (%p1818_p0), %s402_s7, 4294967232 }
  0x3c   : > { %1632 = dma.done.wait (%p62_p1), [#allocation12], 1024  }
  0x3d   : > { %1634 = vsyncadd (%p62_p1), [#allocation12], 4294966272  ;;  %p457_p3 = scmp.lt.s32.totalorder %s1653_s16, 1  ;;  %v1674_v0 = vmov 0   ;;  %p480_p8 = scmp.eq.s32.totalorder %s1657_s17, 0 }
  0x3e   : > { %1466 = vset.pattern.permute.xlu0 %v1674_v0  ;;  %p481_p9 = scmp.eq.s32.totalorder %s1653_s16, 0  ;;  %s1285_s10 = sshll.u32 %s1848_s13, 3  ;;  %v478_v1 = vld [vmem:[%s1982_s3] sm:$0x1]  ;;  %v1675_v5 = vmov 839922192  }
  0x3f   : > { %s458_s9 = scalar_select %p457_p3, %s1653_s16, 1  ;;  %v1882_v3 = vpack.c.bf16 %v478_v1, %v478_v1  ;;  %v471_v6 = vunpack.c.l.s4 %v1675_v5  ;;  %v462_v8 = vld [vmem:[%s405_s8] sm:$0xf] }
  0x40   : > { %p1872_p10 = pnand %p481_p9, %p480_p8  ;;  %v474_v11 = vunpack.c.l.bf16 %v462_v8  ;;  %s1886_s29 = scalar_lea.vmem [#allocation14], %s1285_s10 }
  0x41   : > { %s1286_s18 = sshll.u32 %s458_s9, 3  ;;  %v472_v7 = vunpack.c.0.s8 %v471_v6 }
  0x42   : > { %s460_s26 = scalar_lea.vmem %s1981_s2, %s1286_s18 }
  0x43   : > { %v463_v2 = vld [vmem:[%s460_s26] sm:$0xff] }
  0x44   : > { %v464_v4 = vpack.c.bf16 %v463_v2, %v463_v2 }
  0x46   : > { %467 = vperm.xlu0 %1466, %v464_v4  }
  0xb8   : > { %v468_v9 = vpop.permute.xlu0 %467 }
  0xb9   : > { %v473_v10 = vperm.slane %v468_v9, %v472_v7 }
  0xbb   : > { %v475_v12 = vunpack.c.l.bf16 %v473_v10  ;;  %485 = sbr.rel (%p1872_p10) target bundleno = 227 (0xe3), region = 76 }
  0xbd   : > { %v476_v13 = vmul.f32 %v475_v12, %v474_v11 }
  0xbf   : > { %v1884_v14 = vpack.c.bf16 %v476_v13, %v476_v13 }
  0xc0   : > { %v1676_v15 = vmov 0.0  }
  0xc1   : > { %486 = vst [vmem:[#allocation2 + $0x30] sm:$0xff] %v1676_v15 }
  0xc2   : > { %487 = vst [vmem:[#allocation2] sm:$0xff] %v1676_v15 }
  0xc3   : > { %488 = vst [vmem:[#allocation2 + $0x58] sm:$0xff] %v1676_v15 }
  0xc4   : > { %489 = vst [vmem:[#allocation2 + $0x18] sm:$0xff] %v1676_v15 }
  0xc5   : > { %490 = vst [vmem:[#allocation2 + $0x50] sm:$0xff] %v1676_v15 }
  0xc6   : > { %491 = vst [vmem:[#allocation2 + $0x68] sm:$0xff] %v1676_v15 }
  0xc7   : > { %492 = vst [vmem:[#allocation2 + $0x8] sm:$0xff] %v1676_v15 }
  0xc8   : > { %493 = vst [vmem:[#allocation2 + $0x48] sm:$0xff] %v1676_v15 }
  0xc9   : > { %494 = vst [vmem:[#allocation2 + $0x40] sm:$0xff] %v1676_v15 }
  0xca   : > { %495 = vst [vmem:[#allocation2 + $0x20] sm:$0xff] %v1676_v15 }
  0xcb   : > { %496 = vst [vmem:[#allocation2 + $0x10] sm:$0xff] %v1676_v15 }
  0xcc   : > { %497 = vst [vmem:[#allocation2 + $0x38] sm:$0xff] %v1676_v15 }
  0xcd   : > { %498 = vst [vmem:[#allocation2 + $0x60] sm:$0xff] %v1676_v15 }
  0xce   : > { %499 = vst [vmem:[#allocation2 + $0x70] sm:$0xff] %v1676_v15 }
  0xcf   : > { %500 = vst [vmem:[#allocation2 + $0x78] sm:$0xff] %v1676_v15 }
  0xd0   : > { %501 = vst [vmem:[#allocation2 + $0x28] sm:$0xff] %v1676_v15 }
  0xd1   : > { %502 = vst [vmem:[#allocation3 + $0x28] sm:$0xff] %v1676_v15 }
  0xd2   : > { %503 = vst [vmem:[#allocation3 + $0x68] sm:$0xff] %v1676_v15 }
  0xd3   : > { %504 = vst [vmem:[#allocation3 + $0x10] sm:$0xff] %v1676_v15 }
  0xd4   : > { %505 = vst [vmem:[#allocation3 + $0x40] sm:$0xff] %v1676_v15 }
  0xd5   : > { %506 = vst [vmem:[#allocation3 + $0x48] sm:$0xff] %v1676_v15 }
  0xd6   : > { %507 = vst [vmem:[#allocation3 + $0x30] sm:$0xff] %v1676_v15 }
  0xd7   : > { %508 = vst [vmem:[#allocation3 + $0x70] sm:$0xff] %v1676_v15 }
  0xd8   : > { %509 = vst [vmem:[#allocation3 + $0x38] sm:$0xff] %v1676_v15 }
  0xd9   : > { %510 = vst [vmem:[#allocation3 + $0x20] sm:$0xff] %v1676_v15 }
  0xda   : > { %511 = vst [vmem:[#allocation3 + $0x78] sm:$0xff] %v1676_v15 }
  0xdb   : > { %512 = vst [vmem:[#allocation3 + $0x18] sm:$0xff] %v1676_v15 }
  0xdc   : > { %513 = vst [vmem:[#allocation3 + $0x58] sm:$0xff] %v1676_v15 }
  0xdd   : > { %514 = vst [vmem:[#allocation3] sm:$0xff] %v1676_v15 }
  0xde   : > { %515 = vst [vmem:[#allocation3 + $0x8] sm:$0xff] %v1676_v15 }
  0xdf   : > { %516 = vst [vmem:[#allocation3 + $0x60] sm:$0xff] %v1676_v15 }
  0xe0   : > { %517 = vst [vmem:[#allocation3 + $0x50] sm:$0xff] %v1676_v15 }
  0xe1   : > { %518 = vst [vmem:[#allocation4] sm:$0x1] %v1676_v15 }
  0xe2   : > { %519 = vst [vmem:[#allocation5] sm:$0x1] %v1676_v15 }
  0xe3 PF: > { %p1287_p1 = scmp.ne.s32.totalorder %s1657_s17, 0 }
  0xe5   : > { %522 = sbr.rel (%p1287_p1) target bundleno = 672 (0x2a0), region = 80 }
  0xea   : > { %v578_v16 = vpack.i.b16 %v1882_v3, %v1882_v3  ;;  %v1353_v17 = vld [vmem:[%s1983_s4 + $0x8] sm:$0xff]  ;;  %v581_v19 = vunpack.c.l.bf16 %v1884_v14  ;;  %v1352_v20 = vld [vmem:[%s1983_s4] sm:$0xff]  ;;  %vm544_vm0 = vcmask 261120   ;;  %vm627_vm1 = vcmask 1043456   ;;  %v561_v39 = vld [vmem:[#allocation2 + $0x30] sm:$0xff] }
  0xeb   : > { %554 = vmatpush.bf16.msra.mxu0 %v1353_v17  ;;  %v523_v23 = vld [vmem:[%s1852_s24] sm:$0xf]  ;;  %v1467_v25 = vld [vmem:[%s1984_s5] ss:$0 sm:$0xff]  ;;  %vm602_vm2 = vcmask 64512   ;;  %v563_v45 = vld [vmem:[#allocation2 + $0x58] sm:$0xff] }
  0xec   : > { %v580_v18 = vperm.slane %v578_v16, 0  ;;  %v562_v42 = vld [vmem:[#allocation2] sm:$0xff]  ;;  %v564_v48 = vld [vmem:[#allocation2 + $0x18] sm:$0xff]  ;;  %v565_v51 = vld [vmem:[#allocation2 + $0x50] sm:$0xff] }
  0xed   : > { %v566_v54 = vld [vmem:[#allocation2 + $0x68] sm:$0xff]  ;;  %v569_v63 = vld [vmem:[#allocation2 + $0x40] sm:$0xff]  ;;  %v571_v6 = vld [vmem:[#allocation2 + $0x10] sm:$0xff] }
  0xee   : > { %v582_v21 = vunpack.c.l.bf16 %v580_v18  ;;  %v567_v57 = vld [vmem:[#allocation2 + $0x8] sm:$0xff]  ;;  %v570_v2 = vld [vmem:[#allocation2 + $0x20] sm:$0xff]  ;;  %v572_v9 = vld [vmem:[#allocation2 + $0x38] sm:$0xff] }
  0xef   : > { %555 = vmatpush.bf16.msra.mxu0 %v1352_v20  ;;  %v568_v60 = vld [vmem:[#allocation2 + $0x48] sm:$0xff]  ;;  %v573_v12 = vld [vmem:[#allocation2 + $0x60] sm:$0xff]  ;;  %v574_v16 = vld [vmem:[#allocation2 + $0x70] sm:$0xff] }
  0xf0   : > { %v583_v22 = vmul.f32 %v582_v21, %v581_v19  ;;  %v575_v19 = vld [vmem:[#allocation2 + $0x78] sm:$0xff] }
  0xf2   : > { %v584_v24 = vpack.c.bf16 %v583_v22, %v583_v22  ;;  %1296 = vmatmul.msk.bf16.vlgmr.msra.gmra.mxu0 %vm544_vm0, %v523_v23  ;;  %v576_v22 = vld [vmem:[#allocation2 + $0x28] sm:$0xff] }
  0xf4   : > { %586 = vxpose.xlu0.c.b16.start.end [1/1] (short) %v584_v24, 128 }
 0x16f   : > { %v557_v26 = vpop.f32.mrf.mxu0 }
 0x170   : > { %v558_v27 = vadd.f32 %v1467_v25, %v557_v26 }
 0x172   : > { %v585_v28 = vpack.c.bf16 %v558_v27, %v558_v27 }
 0x174   : > { %v629_v29 = vsel %vm627_vm1, %v585_v28, 0 }
 0x175   : > { %638 = vmatpush.bf16.msra.mxu1 %v629_v29  ;;  %1362 = vmatpush.bf16.msra.mxu2 %v629_v29 }
 0x176   : > { %1363 = vmatpush.bf16.msra.mxu3 %v629_v29 }
 0x177   : > { %v559_v30 = vpop.f32.mrf.mxu0 }
 0x1a0   : > { %v594_v31 = vpop.trf.xlu0 }
 0x1a1   : > { %1297 = vmatmul.msk.bf16.vlgmr.msra.gmra.mxu1 %vm602_vm2, %v594_v31 }
 0x1b0   : > { %v595_v32 = vpop.trf.xlu0 }
 0x1b1   : > { %1298 = vmatmul.msk.bf16.gmra.mxu1 %vm602_vm2, %v595_v32 }
 0x1c0   : > { %v596_v33 = vpop.trf.xlu0 }
 0x1c1   : > { %1299 = vmatmul.msk.bf16.gmra.mxu1 %vm602_vm2, %v596_v33 }
 0x1d0   : > { %v597_v34 = vpop.trf.xlu0 }
 0x1d1   : > { %1300 = vmatmul.msk.bf16.vlgmr.msra.gmra.mxu2 %vm602_vm2, %v597_v34 }
 0x1e0   : > { %v598_v35 = vpop.trf.xlu0 }
 0x1e1   : > { %1301 = vmatmul.msk.bf16.gmra.mxu2 %vm602_vm2, %v598_v35 }
 0x1f0   : > { %v599_v36 = vpop.trf.xlu0 }
 0x1f1   : > { %1302 = vmatmul.msk.bf16.gmra.mxu2 %vm602_vm2, %v599_v36 }
 0x200   : > { %v600_v37 = vpop.trf.xlu0 }
 0x201   : > { %1303 = vmatmul.msk.bf16.vlgmr.msra.gmra.mxu3 %vm602_vm2, %v600_v37 }
 0x210   : > { %v601_v38 = vpop.trf.xlu0 }
 0x211   : > { %1304 = vmatmul.msk.bf16.gmra.mxu3 %vm602_vm2, %v601_v38 }
 0x21e   : > { %v640_v40 = vpop.f32.mrf.mxu1 }
 0x21f   : > { %v680_v41 = vadd.f32 %v640_v40, %v561_v39 }
 0x221   : > { %696 = vst [vmem:[#allocation2 + $0x30] sm:$0xff] %v680_v41 }
 0x226   : > { %v642_v43 = vpop.f32.mrf.mxu1 }
 0x227   : > { %v681_v44 = vadd.f32 %v642_v43, %v562_v42 }
 0x229   : > { %697 = vst [vmem:[#allocation2] sm:$0xff] %v681_v44 }
 0x22e   : > { %v645_v46 = vpop.f32.mrf.mxu1 }
 0x22f   : > { %v682_v47 = vadd.f32 %v645_v46, %v563_v45 }
 0x231   : > { %698 = vst [vmem:[#allocation2 + $0x58] sm:$0xff] %v682_v47 }
 0x236   : > { %v647_v49 = vpop.f32.mrf.mxu1 }
 0x237   : > { %v683_v50 = vadd.f32 %v647_v49, %v564_v48 }
 0x239   : > { %699 = vst [vmem:[#allocation2 + $0x18] sm:$0xff] %v683_v50 }
 0x23e   : > { %v650_v52 = vpop.f32.mrf.mxu1 }
 0x23f   : > { %v684_v53 = vadd.f32 %v650_v52, %v565_v51 }
 0x241   : > { %700 = vst [vmem:[#allocation2 + $0x50] sm:$0xff] %v684_v53 }
 0x246   : > { %v652_v55 = vpop.f32.mrf.mxu1 }
 0x247   : > { %v685_v56 = vadd.f32 %v652_v55, %v566_v54 }
 0x249   : > { %701 = vst [vmem:[#allocation2 + $0x68] sm:$0xff] %v685_v56 }
 0x254   : > { %v655_v58 = vpop.f32.mrf.mxu2 }
 0x255   : > { %v686_v59 = vadd.f32 %v655_v58, %v567_v57 }
 0x257   : > { %702 = vst [vmem:[#allocation2 + $0x8] sm:$0xff] %v686_v59 }
 0x25c   : > { %v657_v61 = vpop.f32.mrf.mxu2 }
 0x25d   : > { %v687_v62 = vadd.f32 %v657_v61, %v568_v60 }
 0x25f   : > { %703 = vst [vmem:[#allocation2 + $0x48] sm:$0xff] %v687_v62 }
 0x264   : > { %v660_v0 = vpop.f32.mrf.mxu2 }
 0x265   : > { %v688_v1 = vadd.f32 %v660_v0, %v569_v63 }
 0x267   : > { %704 = vst [vmem:[#allocation2 + $0x40] sm:$0xff] %v688_v1 }
 0x26c   : > { %v662_v4 = vpop.f32.mrf.mxu2 }
 0x26d   : > { %v689_v5 = vadd.f32 %v662_v4, %v570_v2 }
 0x26f   : > { %705 = vst [vmem:[#allocation2 + $0x20] sm:$0xff] %v689_v5 }
 0x274   : > { %v665_v7 = vpop.f32.mrf.mxu2 }
 0x275   : > { %v690_v8 = vadd.f32 %v665_v7, %v571_v6 }
 0x277   : > { %706 = vst [vmem:[#allocation2 + $0x10] sm:$0xff] %v690_v8 }
 0x27c   : > { %v667_v10 = vpop.f32.mrf.mxu2 }
 0x27d   : > { %v691_v11 = vadd.f32 %v667_v10, %v572_v9 }
 0x27f   : > { %707 = vst [vmem:[#allocation2 + $0x38] sm:$0xff] %v691_v11 }
 0x284   : > { %v670_v13 = vpop.f32.mrf.mxu3 }
 0x285   : > { %v692_v15 = vadd.f32 %v670_v13, %v573_v12 }
 0x287   : > { %708 = vst [vmem:[#allocation2 + $0x60] sm:$0xff] %v692_v15 }
 0x28c   : > { %v672_v17 = vpop.f32.mrf.mxu3 }
 0x28d   : > { %v693_v18 = vadd.f32 %v672_v17, %v574_v16 }
 0x28f   : > { %709 = vst [vmem:[#allocation2 + $0x70] sm:$0xff] %v693_v18 }
 0x294   : > { %v675_v20 = vpop.f32.mrf.mxu3 }
 0x295   : > { %v694_v21 = vadd.f32 %v675_v20, %v575_v19 }
 0x297   : > { %710 = vst [vmem:[#allocation2 + $0x78] sm:$0xff] %v694_v21 }
 0x29c   : > { %v677_v23 = vpop.f32.mrf.mxu3 }
 0x29d   : > { %v695_v24 = vadd.f32 %v677_v23, %v576_v22 }
 0x29f   : > { %711 = vst [vmem:[#allocation2 + $0x28] sm:$0xff] %v695_v24 }
 0x2a0 PF: > { %p712_p11 = scmp.eq.s32.totalorder %s1657_s17, 1  ;;  %p1305_p12 = scmp.ne.s32.totalorder %s1657_s17, 1 }
 0x2a2   : > { %715 = sbr.rel (%p1305_p12) target bundleno = 856 (0x358), region = 84 }
 0x2a7   : > { %v730_v25 = vld [vmem:[#allocation2 + $0x78] sm:$0xff]  ;;  %v731_v26 = vld [vmem:[#allocation2 + $0x28] sm:$0xff]  ;;  %v728_v27 = vld [vmem:[#allocation2 + $0x60] sm:$0xff] }
 0x2a8   : > { %v739_v28 = vpack.c.bf16 %v731_v26, %v730_v25  ;;  %v729_v29 = vld [vmem:[#allocation2 + $0x70] sm:$0xff]  ;;  %v727_v32 = vld [vmem:[#allocation2 + $0x38] sm:$0xff]  ;;  %v724_v34 = vld [vmem:[#allocation2 + $0x40] sm:$0xff] }
 0x2a9   : > { %v738_v30 = vpack.c.bf16 %v729_v29, %v728_v27  ;;  %v726_v31 = vld [vmem:[#allocation2 + $0x10] sm:$0xff]  ;;  %v725_v35 = vld [vmem:[#allocation2 + $0x20] sm:$0xff]  ;;  %v722_v37 = vld [vmem:[#allocation2 + $0x8] sm:$0xff] }
 0x2aa   : > { %740 = vmatpush.bf16.msra.mxu0 %v739_v28  ;;  %v737_v33 = vpack.c.bf16 %v727_v32, %v726_v31  ;;  %v736_v36 = vpack.c.bf16 %v725_v35, %v724_v34  ;;  %v723_v38 = vld [vmem:[#allocation2 + $0x48] sm:$0xff]  ;;  %v720_v40 = vld [vmem:[#allocation2 + $0x50] sm:$0xff]  ;;  %v718_v43 = vld [vmem:[#allocation2 + $0x58] sm:$0xff] }
 0x2ab   : > { %v735_v39 = vpack.c.bf16 %v723_v38, %v722_v37  ;;  %v721_v41 = vld [vmem:[#allocation2 + $0x68] sm:$0xff]  ;;  %v719_v44 = vld [vmem:[#allocation2 + $0x18] sm:$0xff]  ;;  %v716_v46 = vld [vmem:[#allocation2 + $0x30] sm:$0xff] }
 0x2ac   : > { %v734_v42 = vpack.c.bf16 %v721_v41, %v720_v40  ;;  %v733_v45 = vpack.c.bf16 %v719_v44, %v718_v43  ;;  %v717_v47 = vld [vmem:[#allocation2] sm:$0xff] }
 0x2ad   : > { %v732_v48 = vpack.c.bf16 %v717_v47, %v716_v46  ;;  %v753_v61 = vld [vmem:[#allocation4] sm:$0x1]  ;;  %v762_v0 = vld [vmem:[#allocation5] sm:$0x1] }
 0x2ae   : > { %741 = vmatpush.bf16.msra.mxu0 %v738_v30 }
 0x2b2   : > { %742 = vmatpush.bf16.msra.mxu0 %v737_v33 }
 0x2b6   : > { %743 = vmatpush.bf16.msra.mxu0 %v736_v36 }
 0x2ba   : > { %744 = vmatpush.bf16.msra.mxu0 %v735_v39 }
 0x2be   : > { %745 = vmatpush.bf16.msra.mxu0 %v734_v42 }
 0x2c2   : > { %746 = vmatpush.bf16.msra.mxu0 %v733_v45 }
 0x2c6   : > { %747 = vmatpush.bf16.msra.mxu0 %v732_v48 }
 0x2c9   : > { %748 = vmatmul.bf16.vlgmr.msra.gmra.mxu0 %v1884_v14 }
 0x346   : > { %v749_v49 = vpop.f32.mrf.mxu0 }
 0x347   : > { %v754_v50 = vrot.slane %v749_v49, 4  ;;  %v763_v51 = vmul.f32 %v749_v49, %v749_v49 }
 0x349   : > { %v755_v52 = vadd.f32 %v754_v50, %v749_v49  ;;  %v764_v53 = vrot.slane %v763_v51, 4 }
 0x34b   : > { %v756_v54 = vrot.slane %v755_v52, 2  ;;  %v765_v55 = vadd.f32 %v764_v53, %v763_v51 }
 0x34d   : > { %v757_v56 = vadd.f32 %v756_v54, %v755_v52  ;;  %v766_v57 = vrot.slane %v765_v55, 2 }
 0x34e   : > { %v751_v58 = vpop.f32.mrf.mxu0 }
 0x34f   : > { %v758_v59 = vrot.slane %v757_v56, 1  ;;  %v767_v60 = vadd.f32 %v766_v57, %v765_v55 }
 0x351   : > { %v759_v62 = vadd.f32 %v758_v59, %v757_v56  ;;  %v768_v63 = vrot.slane %v767_v60, 1 }
 0x353   : > { %v760_v1 = vadd.f32 %v759_v62, %v753_v61  ;;  %v769_v2 = vadd.f32 %v768_v63, %v767_v60 }
 0x355   : > { %761 = vst [vmem:[#allocation4] sm:$0x1] %v760_v1  ;;  %v770_v4 = vadd.f32 %v769_v2, %v762_v0 }
 0x357   : > { %771 = vst [vmem:[#allocation5] sm:$0x1] %v770_v4 }
 0x358 PF: > { %p772_p13 = scmp.eq.s32.totalorder %s1653_s16, 1 }
 0x35a   : > { %p773_p0 = pnand %p772_p13, %p712_p11 }
 0x35b   : > { %s2020_s7 = sld [smem:[#allocation28_spill]] (!%p773_p0) }
 0x35c   : > { %776 = sbr.rel (%p773_p0) target bundleno = 901 (0x385), region = 88  ;;  %s2021_s10 = sld [smem:[#allocation29_spill]] (!%p773_p0) }
 0x361   : > { %v777_v5 = vld [vmem:[#allocation4] sm:$0x1]  ;;  %v779_v6 = vld [vmem:[#allocation5] sm:$0x1] }
 0x362   : > { %v778_v7 = vmul.f32 0.0625, %v777_v5  ;;  %v780_v8 = vmul.f32 0.0625, %v779_v6  ;;  %v784_v19 = vld [vmem:[%s2020_s7] sm:$0x1] }
 0x363   : > { %v798_v23 = vld [vmem:[%s2021_s10] sm:$0x1] }
 0x364   : > { %v781_v9 = vmul.f32 %v778_v7, %v778_v7 }
 0x366   : > { %v782_v10 = vsub.f32 %v780_v8, %v781_v9 }
 0x368   : > { %v783_v11 = vmax.f32 %v782_v10, 0.0 }
 0x36a   : > { %v785_v12 = vadd.f32 1e-05, %v783_v11 }
 0x36c   : > { %1468 = vrsqrt.f32 %v785_v12  ;;  %vm792_vm3 = vweird.f32 %v785_v12 }
 0x372   : > { %v1469_v13 = vpop.eup %1468 }
 0x373   : > { %v787_v15 = vmul.f32 %v1469_v13, %v785_v12  ;;  %vm793_vm4 = vweird.f32 %v1469_v13 }
 0x374   : > { %vm794_vm5 = vmor %vm792_vm3, %vm793_vm4 }
 0x375   : > { %v788_v16 = vmul.f32 %v1469_v13, %v787_v15 }
 0x377   : > { %v789_v17 = vmul.f32 0.5, %v788_v16 }
 0x379   : > { %v790_v18 = vsub.f32 1.5, %v789_v17 }
 0x37b   : > { %v791_v20 = vmul.f32 %v1469_v13, %v790_v18 }
 0x37d   : > { %v795_v21 = vsel %vm794_vm5, %v1469_v13, %v791_v20 }
 0x37e   : > { %v796_v22 = vmul.f32 %v795_v21, %v784_v19 }
 0x380   : > { %797 = vst [vmem:[#allocation6] sm:$0x1] %v796_v22  ;;  %v799_v24 = vmul.f32 %v796_v22, %v778_v7 }
 0x382   : > { %v800_v25 = vsub.f32 %v798_v23, %v799_v24 }
 0x384   : > { %801 = vst [vmem:[#allocation7] sm:$0x1] %v800_v25 }
 0x385 PF: > { %p1306_p4 = scmp.ne.s32.totalorder %s1657_s17, 2 }
 0x386   : > { %s2022_s25 = sld [smem:[#allocation31_spill]] (!%p1306_p4) }
 0x387   : > { %805 = sbr.rel (%p1306_p4) target bundleno = 1403 (0x57b), region = 92 }
 0x38c   : > { %v820_v26 = vld [vmem:[#allocation2 + $0x78] sm:$0xff]  ;;  %v821_v27 = vld [vmem:[#allocation2 + $0x28] sm:$0xff]  ;;  %v818_v28 = vld [vmem:[#allocation2 + $0x60] sm:$0xff]  ;;  %v955_v31 = vpack.i.b16 %v1882_v3, %v1882_v3  ;;  %v958_v36 = vunpack.c.l.bf16 %v1884_v14  ;;  %vm1004_vm7 = vcmask 1043456   ;;  %vm979_vm8 = vcmask 64512  }
 0x38d   : > { %v829_v29 = vpack.c.bf16 %v821_v27, %v820_v26  ;;  %v819_v30 = vld [vmem:[#allocation2 + $0x70] sm:$0xff]  ;;  %v817_v34 = vld [vmem:[#allocation2 + $0x38] sm:$0xff]  ;;  %v1360_v40 = vld [vmem:[#allocation13 + $0x30] sm:$0xff] }
 0x38e   : > { %v828_v32 = vpack.c.bf16 %v819_v30, %v818_v28  ;;  %v816_v33 = vld [vmem:[#allocation2 + $0x10] sm:$0xff]  ;;  %v957_v35 = vperm.slane %v955_v31, 0  ;;  %v814_v41 = vld [vmem:[#allocation2 + $0x40] sm:$0xff]  ;;  %v812_v46 = vld [vmem:[#allocation2 + $0x8] sm:$0xff] }
 0x38f   : > { %830 = vmatpush.bf16.msra.mxu0 %v829_v29  ;;  %v1361_v37 = vld [vmem:[#allocation13 + $0x38] sm:$0xff]  ;;  %v827_v39 = vpack.c.bf16 %v817_v34, %v816_v33  ;;  %v815_v42 = vld [vmem:[#allocation2 + $0x20] sm:$0xff]  ;;  %v1358_v49 = vld [vmem:[#allocation13 + $0x20] sm:$0xff] }
 0x390   : > { %v959_v38 = vunpack.c.l.bf16 %v957_v35  ;;  %925 = vmatpush.bf16.msra.mxu1 %v1361_v37  ;;  %v826_v45 = vpack.c.bf16 %v815_v42, %v814_v41  ;;  %v1359_v3 = vld [vmem:[#allocation13 + $0x28] sm:$0xff]  ;;  %v813_v47 = vld [vmem:[#allocation2 + $0x48] sm:$0xff]  ;;  %v810_v50 = vld [vmem:[#allocation2 + $0x50] sm:$0xff] }
 0x391   : > { %v825_v48 = vpack.c.bf16 %v813_v47, %v812_v46  ;;  %v811_v51 = vld [vmem:[#allocation2 + $0x68] sm:$0xff]  ;;  %v808_v54 = vld [vmem:[#allocation2 + $0x58] sm:$0xff]  ;;  %v806_v58 = vld [vmem:[#allocation2 + $0x30] sm:$0xff] }
 0x392   : > { %v960_v43 = vmul.f32 %v959_v38, %v958_v36  ;;  %v824_v52 = vpack.c.bf16 %v811_v51, %v810_v50  ;;  %v1357_v53 = vld [vmem:[#allocation13 + $0x18] sm:$0xff]  ;;  %v809_v55 = vld [vmem:[#allocation2 + $0x18] sm:$0xff]  ;;  %v1356_v57 = vld [vmem:[#allocation13 + $0x10] sm:$0xff] }
 0x393   : > { %831 = vmatpush.bf16.msra.mxu0 %v828_v32  ;;  %v823_v56 = vpack.c.bf16 %v809_v55, %v808_v54  ;;  %v807_v59 = vld [vmem:[#allocation2] sm:$0xff]  ;;  %v1354_v62 = vld [vmem:[#allocation13] sm:$0xff]  ;;  %v938_v24 = vld [vmem:[#allocation3 + $0x28] sm:$0xff] }
 0x394   : > { %v961_v44 = vpack.c.bf16 %v960_v43, %v960_v43  ;;  %926 = vmatpush.bf16.msra.mxu1 %v1360_v40  ;;  %v822_v60 = vpack.c.bf16 %v807_v59, %v806_v58  ;;  %v1355_v61 = vld [vmem:[#allocation13 + $0x8] sm:$0xff]  ;;  %v939_v30 = vld [vmem:[#allocation3 + $0x68] sm:$0xff]  ;;  %v940_v36 = vld [vmem:[#allocation3 + $0x10] sm:$0xff] }
 0x395   : > { %v1470_v63 = vld [vmem:[#allocation6] ss:$0 sm:$0xff]  ;;  %v1471_v0 = vld [vmem:[#allocation7] ss:$0 sm:$0xff]  ;;  %v1472_v13 = vld [vmem:[%s2022_s25] ss:$0 sm:$0xff] }
 0x396   : > { %963 = vxpose.xlu0.c.b16.start.end [1/1] (short) %v961_v44, 128  ;;  %v946_v25 = vld [vmem:[#allocation3 + $0x20] sm:$0xff]  ;;  %v947_v31 = vld [vmem:[#allocation3 + $0x78] sm:$0xff]  ;;  %v942_v47 = vld [vmem:[#allocation3 + $0x48] sm:$0xff] }
 0x397   : > { %832 = vmatpush.bf16.msra.mxu0 %v827_v39  ;;  %v948_v37 = vld [vmem:[#allocation3 + $0x18] sm:$0xff]  ;;  %v941_v42 = vld [vmem:[#allocation3 + $0x40] sm:$0xff]  ;;  %v951_v54 = vld [vmem:[#allocation3 + $0x8] sm:$0xff] }
 0x398   : > { %927 = vmatpush.bf16.msra.mxu1 %v1359_v3  ;;  %v949_v43 = vld [vmem:[#allocation3 + $0x58] sm:$0xff]  ;;  %v944_v59 = vld [vmem:[#allocation3 + $0x70] sm:$0xff] }
 0x39b   : > { %833 = vmatpush.bf16.msra.mxu0 %v826_v45 }
 0x39c   : > { %928 = vmatpush.bf16.msra.mxu1 %v1358_v49 }
 0x39f   : > { %834 = vmatpush.bf16.msra.mxu0 %v825_v48  ;;  %v950_v48 = vld [vmem:[#allocation3] sm:$0xff] }
 0x3a0   : > { %929 = vmatpush.bf16.msra.mxu1 %v1357_v53  ;;  %v943_v53 = vld [vmem:[#allocation3 + $0x30] sm:$0xff] }
 0x3a3   : > { %835 = vmatpush.bf16.msra.mxu0 %v824_v52 }
 0x3a4   : > { %930 = vmatpush.bf16.msra.mxu1 %v1356_v57 }
 0x3a7   : > { %836 = vmatpush.bf16.msra.mxu0 %v823_v56 }
 0x3a8   : > { %931 = vmatpush.bf16.msra.mxu1 %v1355_v61 }
 0x3ab   : > { %837 = vmatpush.bf16.msra.mxu0 %v822_v60  ;;  %v952_v60 = vld [vmem:[#allocation3 + $0x60] sm:$0xff] }
 0x3ac   : > { %932 = vmatpush.bf16.msra.mxu1 %v1354_v62 }
 0x3ae   : > { %838 = vmatmul.bf16.vlgmr.msra.gmra.mxu0 %v1884_v14 }
 0x42b   : > { %v839_v1 = vpop.f32.mrf.mxu0 }
 0x42c   : > { %v847_v2 = vmul.f32 %v1470_v63, %v839_v1  ;;  %v945_v1 = vld [vmem:[#allocation3 + $0x38] sm:$0xff] }
 0x42e   : > { %v852_v4 = vadd.f32 %v1471_v0, %v847_v2  ;;  %v953_v2 = vld [vmem:[#allocation3 + $0x50] sm:$0xff] }
 0x430   : > { %vm853_vm6 = vcmp.ge.f32.partialorder %v852_v4, 0.0  ;;  %v854_v5 = vmul.f32 0.1, %v852_v4 }
 0x432   : > { %v855_v6 = vsel %vm853_vm6, %v852_v4, %v854_v5 }
 0x433   : > { %v841_v7 = vpop.f32.mrf.mxu0  ;;  %v856_v8 = vpack.c.bf16 %v855_v6, %v855_v6 }
 0x435   : > { %933 = vmatmul.bf16.vlgmr.msra.gmra.mxu1 %v856_v8 }
 0x442   : > { %v971_v9 = vpop.trf.xlu0 }
 0x452   : > { %v972_v10 = vpop.trf.xlu0 }
 0x462   : > { %v973_v11 = vpop.trf.xlu0 }
 0x472   : > { %v974_v12 = vpop.trf.xlu0 }
 0x482   : > { %v975_v19 = vpop.trf.xlu0 }
 0x492   : > { %v976_v21 = vpop.trf.xlu0 }
 0x4a2   : > { %v977_v22 = vpop.trf.xlu0 }
 0x4b2   : > { %v934_v15 = vpop.f32.mrf.mxu1  ;;  %v978_v23 = vpop.trf.xlu0 }
 0x4b3   : > { %v935_v16 = vadd.f32 %v1472_v13, %v934_v15 }
 0x4b5   : > { %v962_v17 = vpack.c.bf16 %v935_v16, %v935_v16 }
 0x4b7   : > { %v1006_v18 = vsel %vm1004_vm7, %v962_v17, 0 }
 0x4b8   : > { %1015 = vmatpush.bf16.msra.mxu2 %v1006_v18  ;;  %1364 = vmatpush.bf16.msra.mxu3 %v1006_v18 }
 0x4ba   : > { %v936_v20 = vpop.f32.mrf.mxu1 }
 0x4bb   : > { %1339 = vmatmul.msk.bf16.vlgmr.msra.gmra.mxu2 %vm979_vm8, %v971_v9  ;;  %1343 = vmatmul.msk.bf16.vlgmr.msra.gmra.mxu3 %vm979_vm8, %v975_v19 }
 0x4cb   : > { %1340 = vmatmul.msk.bf16.gmra.mxu2 %vm979_vm8, %v972_v10  ;;  %1344 = vmatmul.msk.bf16.gmra.mxu3 %vm979_vm8, %v976_v21 }
 0x4db   : > { %1341 = vmatmul.msk.bf16.gmra.mxu2 %vm979_vm8, %v973_v11  ;;  %1345 = vmatmul.msk.bf16.gmra.mxu3 %vm979_vm8, %v977_v22 }
 0x4eb   : > { %1342 = vmatmul.msk.bf16.gmra.mxu2 %vm979_vm8, %v974_v12  ;;  %1346 = vmatmul.msk.bf16.gmra.mxu3 %vm979_vm8, %v978_v23 }
 0x53e   : > { %v1017_v26 = vpop.f32.mrf.mxu2  ;;  %v1037_v27 = vpop.f32.mrf.mxu3 }
 0x53f   : > { %v1057_v28 = vadd.f32 %v1017_v26, %v938_v24  ;;  %v1065_v29 = vadd.f32 %v1037_v27, %v946_v25 }
 0x541   : > { %1073 = vst [vmem:[#allocation3 + $0x28] sm:$0xff] %v1057_v28 }
 0x542   : > { %1081 = vst [vmem:[#allocation3 + $0x20] sm:$0xff] %v1065_v29 }
 0x546   : > { %v1019_v32 = vpop.f32.mrf.mxu2  ;;  %v1039_v33 = vpop.f32.mrf.mxu3 }
 0x547   : > { %v1058_v34 = vadd.f32 %v1019_v32, %v939_v30  ;;  %v1066_v35 = vadd.f32 %v1039_v33, %v947_v31 }
 0x549   : > { %1074 = vst [vmem:[#allocation3 + $0x68] sm:$0xff] %v1058_v34 }
 0x54a   : > { %1082 = vst [vmem:[#allocation3 + $0x78] sm:$0xff] %v1066_v35 }
 0x54e   : > { %v1022_v38 = vpop.f32.mrf.mxu2  ;;  %v1042_v39 = vpop.f32.mrf.mxu3 }
 0x54f   : > { %v1059_v40 = vadd.f32 %v1022_v38, %v940_v36  ;;  %v1067_v41 = vadd.f32 %v1042_v39, %v948_v37 }
 0x551   : > { %1075 = vst [vmem:[#allocation3 + $0x10] sm:$0xff] %v1059_v40 }
 0x552   : > { %1083 = vst [vmem:[#allocation3 + $0x18] sm:$0xff] %v1067_v41 }
 0x556   : > { %v1024_v44 = vpop.f32.mrf.mxu2  ;;  %v1044_v45 = vpop.f32.mrf.mxu3 }
 0x557   : > { %v1060_v3 = vadd.f32 %v1024_v44, %v941_v42  ;;  %v1068_v46 = vadd.f32 %v1044_v45, %v949_v43 }
 0x559   : > { %1076 = vst [vmem:[#allocation3 + $0x40] sm:$0xff] %v1060_v3 }
 0x55a   : > { %1084 = vst [vmem:[#allocation3 + $0x58] sm:$0xff] %v1068_v46 }
 0x55e   : > { %v1027_v49 = vpop.f32.mrf.mxu2  ;;  %v1047_v50 = vpop.f32.mrf.mxu3 }
 0x55f   : > { %v1061_v51 = vadd.f32 %v1027_v49, %v942_v47  ;;  %v1069_v52 = vadd.f32 %v1047_v50, %v950_v48 }
 0x561   : > { %1077 = vst [vmem:[#allocation3 + $0x48] sm:$0xff] %v1061_v51 }
 0x562   : > { %1085 = vst [vmem:[#allocation3] sm:$0xff] %v1069_v52 }
 0x566   : > { %v1029_v55 = vpop.f32.mrf.mxu2  ;;  %v1049_v56 = vpop.f32.mrf.mxu3 }
 0x567   : > { %v1062_v57 = vadd.f32 %v1029_v55, %v943_v53  ;;  %v1070_v58 = vadd.f32 %v1049_v56, %v951_v54 }
 0x569   : > { %1078 = vst [vmem:[#allocation3 + $0x30] sm:$0xff] %v1062_v57 }
 0x56a   : > { %1086 = vst [vmem:[#allocation3 + $0x8] sm:$0xff] %v1070_v58 }
 0x56e   : > { %v1032_v61 = vpop.f32.mrf.mxu2  ;;  %v1052_v62 = vpop.f32.mrf.mxu3 }
 0x56f   : > { %v1063_v63 = vadd.f32 %v1032_v61, %v944_v59  ;;  %v1071_v0 = vadd.f32 %v1052_v62, %v952_v60 }
 0x571   : > { %1079 = vst [vmem:[#allocation3 + $0x70] sm:$0xff] %v1063_v63 }
 0x572   : > { %1087 = vst [vmem:[#allocation3 + $0x60] sm:$0xff] %v1071_v0 }
 0x576   : > { %v1034_v4 = vpop.f32.mrf.mxu2  ;;  %v1054_v5 = vpop.f32.mrf.mxu3 }
 0x577   : > { %v1064_v6 = vadd.f32 %v1034_v4, %v945_v1  ;;  %v1072_v7 = vadd.f32 %v1054_v5, %v953_v2 }
 0x579   : > { %1080 = vst [vmem:[#allocation3 + $0x38] sm:$0xff] %v1064_v6 }
 0x57a   : > { %1088 = vst [vmem:[#allocation3 + $0x50] sm:$0xff] %v1072_v7 }
 0x57b PF: > { %p1347_p5 = scmp.ne.s32.totalorder %s1657_s17, 3 }
 0x57d   : > { %1092 = sbr.rel (%p1347_p5) target bundleno = 1578 (0x62a), region = 96 }
 0x582   : > { %v1107_v8 = vld [vmem:[#allocation3 + $0x60] sm:$0xff]  ;;  %v1108_v9 = vld [vmem:[#allocation3 + $0x50] sm:$0xff]  ;;  %v1106_v12 = vld [vmem:[#allocation3 + $0x8] sm:$0xff] }
 0x583   : > { %v1105_v10 = vld [vmem:[#allocation3] sm:$0xff]  ;;  %v1116_v11 = vpack.c.bf16 %v1108_v9, %v1107_v8  ;;  %v1103_v15 = vld [vmem:[#allocation3 + $0x18] sm:$0xff]  ;;  %v1099_v21 = vld [vmem:[#allocation3 + $0x70] sm:$0xff] }
 0x584   : > { %v1115_v13 = vpack.c.bf16 %v1106_v12, %v1105_v10  ;;  %v1104_v16 = vld [vmem:[#allocation3 + $0x58] sm:$0xff]  ;;  %v1101_v18 = vld [vmem:[#allocation3 + $0x20] sm:$0xff]  ;;  %v1097_v24 = vld [vmem:[#allocation3 + $0x48] sm:$0xff] }
 0x585   : > { %1117 = vmatpush.bf16.msra.mxu0 %v1116_v11  ;;  %v1114_v17 = vpack.c.bf16 %v1104_v16, %v1103_v15  ;;  %v1102_v19 = vld [vmem:[#allocation3 + $0x78] sm:$0xff]  ;;  %v1098_v25 = vld [vmem:[#allocation3 + $0x30] sm:$0xff]  ;;  %v1096_v28 = vld [vmem:[#allocation3 + $0x40] sm:$0xff] }
 0x586   : > { %v1113_v20 = vpack.c.bf16 %v1102_v19, %v1101_v18  ;;  %v1100_v22 = vld [vmem:[#allocation3 + $0x38] sm:$0xff]  ;;  %v1111_v26 = vpack.c.bf16 %v1098_v25, %v1097_v24  ;;  %v1095_v27 = vld [vmem:[#allocation3 + $0x10] sm:$0xff]  ;;  %v1093_v30 = vld [vmem:[#allocation3 + $0x28] sm:$0xff] }
 0x587   : > { %v1112_v23 = vpack.c.bf16 %v1100_v22, %v1099_v21  ;;  %v1110_v29 = vpack.c.bf16 %v1096_v28, %v1095_v27  ;;  %v1094_v31 = vld [vmem:[#allocation3 + $0x68] sm:$0xff] }
 0x588   : > { %v1109_v32 = vpack.c.bf16 %v1094_v31, %v1093_v30 }
 0x589   : > { %1118 = vmatpush.bf16.msra.mxu0 %v1115_v13 }
 0x58d   : > { %1119 = vmatpush.bf16.msra.mxu0 %v1114_v17 }
 0x591   : > { %1120 = vmatpush.bf16.msra.mxu0 %v1113_v20 }
 0x595   : > { %1121 = vmatpush.bf16.msra.mxu0 %v1112_v23 }
 0x599   : > { %1122 = vmatpush.bf16.msra.mxu0 %v1111_v26 }
 0x59d   : > { %1123 = vmatpush.bf16.msra.mxu0 %v1110_v29 }
 0x5a1   : > { %1124 = vmatpush.bf16.msra.mxu0 %v1109_v32 }
 0x5a4   : > { %1125 = vmatmul.bf16.vlgmr.msra.gmra.mxu0 %v1884_v14 }
 0x621   : > { %v1126_v33 = vpop.f32.mrf.mxu0 }
 0x622   : > { %1130 = vst [vmem:[%s1886_s29] sm:$0xff] %v1126_v33 }
 0x629   : > { %v1128_v34 = vpop.f32.mrf.mxu0 }
 0x62a PF: > { %s1349_s21 = sshll.u32 %s1653_s16, 3  ;;  %s2024_s28 = sld [smem:[#allocation32_spill]] }
 0x62b   : > { %s1144_s22 = sshll.u32 %s1886_s29, 4  ;;  %s1132_s11 = scalar_lea.sflag [#allocation10], %s1848_s13  ;;  %s1145_s22 = int_to_ptr.vmem [resolvable:$true] %s1144_s22 }
 0x630   : > { %s1142_s23 = scalar_lea.hbm %s2024_s28, %s1349_s21  ;;  %s1583_s16 = scalar_lea.hbm %s2024_s28, 16 }
 0x631   : > { %s1146_s30 = sshll.u32 %s1142_s23, 4  ;;  %s1147_s30 = int_to_ptr.hbm [resolvable:$true] %s1146_s30 }
 0x632   : > { %s1577_s19 = sshra.s32 %s1147_s30, 4  ;;  %s1578_s19 = int_to_ptr.hbm [resolvable:$true] %s1577_s19 }
 0x633   : > { %s1579_s12 = scalar_lea.hbm %s1578_s19, 8  ;;  %p1584_p9 = scmp.lt.s32.totalorder %s1578_s19, %s2024_s28 }
 0x634   : > { %p1580_p7 = scmp.ne.s32.totalorder %s1578_s19, %s1579_s12  ;;  %p1585_p10 = scmp.lt.s32.totalorder %s1583_s16, %s1579_s12 }
 0x636   : > { %p1581_p3 = pnand %p1580_p7, %p1825_p2  ;;  %p1586_p1 = por %p1585_p10, %p1584_p9 }
 0x638   : > { %p1582_p8 = pneg %p1581_p3 }
 0x63a   : > { %p1587_p11 = pnand %p1586_p1, %p1582_p8 }
 0x63c   : > { %1590 = shalt.err (!%p1587_p11)
}
 0x63d   : > { %1373 = dma.vmem_to_hbm [thread:$0]  (%p1825_p2), %s1145_s22, 128, %s1147_s30, %s1132_s11  }
 0x63e PF: > { %s2025_s13 = sld [smem:[#allocation19_spill]]  ;;  %p1393_p12 = scmp.ge.s32.totalorder %s1669_s20, 2 }
 0x640   : > { %p1387_p13 = pnand %p1393_p12, %p1832_p6 }
 0x642   : > { %p1388_p0 = pneg %p1387_p13 }
 0x644   : > { %s1158_s9 = sand.u32 1, %s2025_s13  }
 0x645   : > { %s1159_s10 = scalar_lea.sflag [#allocation10], %s1158_s9 }
 0x646   : > { %1636 = dma.done.wait (%p1388_p0), %s1159_s10, 128  }
 0x647   : > { %1638 = vsyncadd (%p1388_p0), %s1159_s10, 4294967168  ;;  %s29_s20 = sadd.s32 1, %s1669_s20   ;;  %s2027_s15 = sld [smem:[#allocation20_spill]] }
 0x648   : > { %p26_p4 = scmp.ge.s32.totalorder %s29_s20, 10   ;;  %s2028_s18 = sld [smem:[#allocation25_spill]] }
 0x649   : > { %s2029_s16 = sld [smem:[#allocation21_spill]]  ;;  %s2033_s13 = smov %s1645_s14 }
 0x64a   : > { %s2030_s17 = sld [smem:[#allocation22_spill]] }
 0x64b   : > { %s2031_s25 = sld [smem:[#allocation23_spill]] }
 0x64c   : > { %s2032_s19 = sld [smem:[#allocation24_spill]] }
 0x64d   : > { %s2034_s14 = smov %s2027_s15  ;;  %28 = sbr.rel (!%p26_p4) target bundleno = 15 (0xf), region = 149 }
 0x64e   : > { %s2035_s15 = smov %s2028_s18 }
 0x651   : > { %s2036_s18 = smov %s2031_s25 }
 0x652   :  { %1165 = vsyncpa [#allocation9], 1 }
 0x653   :  { %1167 = vsyncpa [#allocation9 + $0x1], 1 }
 0x654   :  { %1168 = vsyncpa [#allocation12], 1 }
 0x655   :  { %1170 = vsyncpa [#allocation12 + $0x1], 1 }
 0x656   :  { %1171 = vsyncpa [#allocation10], 1 }
 0x657   :  { %1173 = vsyncpa [#allocation10 + $0x1], 1 }

</bundles_post_ra>
